<compile_context>
chip_gen: v7x
topology: tpu7x:2x2x1
jax: 0.10.0
libtpu: 0.0.40
codegen_flags: <defaults>
</compile_context>

<pallas_src>
import functools

import jax
import jax.numpy as jnp
from jax import lax
from jax.experimental import pallas as pl
from jax.experimental.pallas import tpu as pltpu

EPS = 1e-5

# VMEM sizing: 48 MiB scoped limit is comfortably below v7x's 64 MiB physical
# VMEM and well within v5e/v6e's 128 MiB; tiles target <= ~24 MiB of
# double-buffered in+out working set so 2x pipelining always fits.
_VMEM_LIMIT_BYTES = 48 * 1024 * 1024
_TILE_BUDGET_BYTES = 24 * 1024 * 1024
_MAX_ROW_TILE = 1024


def _cdiv(a, b):
    return -(-a // b)


def _round_up(x, m):
    return _cdiv(x, m) * m


def _plan_rows(rows, per_row_bytes, *, align=8,
               budget=_TILE_BUDGET_BYTES, cap=_MAX_ROW_TILE):
    """Choose (row_tile, grid_steps, padded_rows).

    - row_tile is a multiple of `align` and keeps the double-buffered
      in+out working set under `budget`.
    - >= 2 grid steps whenever there is more than one aligned row group,
      so the parallel grid axis can shard across v7x's two TensorCores.
    - padded_rows = row_tile * grid_steps (no remainder is ever dropped).
    """
    rows_a = _round_up(max(rows, align), align)
    tr_max = min(cap, max(align, budget // max(per_row_bytes, 1)))
    tr_max = max(align, (tr_max // align) * align)
    steps = _cdiv(rows_a, tr_max)
    if rows_a > align:
        steps = max(steps, 2)
    tr = _round_up(_cdiv(rows_a, steps), align)
    return tr, steps, tr * steps


def _pad2d(a, rows_p, cols_p):
    r, c = a.shape
    if r == rows_p and c == cols_p:
        return a
    return jnp.pad(a, ((0, rows_p - r), (0, cols_p - c)))


# ---------------------------------------------------------------------------
# Kernel 1 (training, track_running_stats=True):
#   fused row-wise mean / biased var over the lane axis + normalize + affine.
#   Padded lanes (>= n_valid) hold zeros and are masked out of the variance.
# ---------------------------------------------------------------------------
def _stats_norm_kernel(x_ref, gamma_ref, beta_ref,
                       out_ref, mean_ref, var_ref, *, n_valid):
    x = x_ref[...].astype(jnp.float32)                       # (tr, cols_p)
    lane = lax.broadcasted_iota(jnp.int32, x.shape, 1)
    valid = lane < n_valid
    inv_n = jnp.float32(1.0 / n_valid)
    mean = jnp.sum(x, axis=1, keepdims=True) * inv_n          # pad lanes are 0
    d = jnp.where(valid, x - mean, 0.0)
    var = jnp.sum(d * d, axis=1, keepdims=True) * inv_n       # biased
    inv_std = lax.rsqrt(var + EPS)                            # EUP slot
    scale = gamma_ref[...] * inv_std
    shift = beta_ref[...] - mean * scale
    out_ref[...] = (x * scale + shift).astype(out_ref.dtype)
    mean_ref[...] = mean
    var_ref[...] = var


def _stats_norm(x2d_p, gamma_p, beta_p, *, n_valid, tr):
    rows_p, cols_p = x2d_p.shape
    assert rows_p % tr == 0 and cols_p % 128 == 0
    kernel = functools.partial(_stats_norm_kernel, n_valid=n_valid)
    return pl.pallas_call(
        kernel,
        out_shape=(jax.ShapeDtypeStruct((rows_p, cols_p), x2d_p.dtype),
                   jax.ShapeDtypeStruct((rows_p, 1), jnp.float32),
                   jax.ShapeDtypeStruct((rows_p, 1), jnp.float32)),
        grid=(rows_p // tr,),
        in_specs=[pl.BlockSpec((tr, cols_p), lambda i: (i, 0)),
                  pl.BlockSpec((tr, 1), lambda i: (i, 0)),
                  pl.BlockSpec((tr, 1), lambda i: (i, 0))],
        out_specs=(pl.BlockSpec((tr, cols_p), lambda i: (i, 0)),
                   pl.BlockSpec((tr, 1), lambda i: (i, 0)),
                   pl.BlockSpec((tr, 1), lambda i: (i, 0))),
        compiler_params=pltpu.CompilerParams(
            dimension_semantics=("parallel",),
            vmem_limit_bytes=_VMEM_LIMIT_BYTES),
    )(x2d_p, gamma_p, beta_p)


# ---------------------------------------------------------------------------
# Kernel 2 (eval, track_running_stats=True):
#   out = x * scale + shift, with scale/shift pre-folded from the running
#   stats + gamma/beta in the wrapper (only 2 column inputs).
# ---------------------------------------------------------------------------
def _scale_shift_kernel(x_ref, scale_ref, shift_ref, out_ref):
    x = x_ref[...].astype(jnp.float32)
    out_ref[...] = (x * scale_ref[...] + shift_ref[...]).astype(out_ref.dtype)


def _scale_shift(x2d_p, scale_p, shift_p, *, tr):
    rows_p, cols_p = x2d_p.shape
    assert rows_p % tr == 0 and cols_p % 128 == 0
    return pl.pallas_call(
        _scale_shift_kernel,
        out_shape=jax.ShapeDtypeStruct((rows_p, cols_p), x2d_p.dtype),
        grid=(rows_p // tr,),
        in_specs=[pl.BlockSpec((tr, cols_p), lambda i: (i, 0)),
                  pl.BlockSpec((tr, 1), lambda i: (i, 0)),
                  pl.BlockSpec((tr, 1), lambda i: (i, 0))],
        out_specs=pl.BlockSpec((tr, cols_p), lambda i: (i, 0)),
        compiler_params=pltpu.CompilerParams(
            dimension_semantics=("parallel",),
            vmem_limit_bytes=_VMEM_LIMIT_BYTES),
    )(x2d_p, scale_p, shift_p)


# ---------------------------------------------------------------------------
# Kernel 3 (track_running_stats=False):
#   per-(batch,channel,node) normalization over time with unbiased variance.
#   Layout is (B*C, T, N_pad): nodes on lanes (dense), time on sublanes
#   (reduced through the XLU); padding along N is harmless and sliced off.
# ---------------------------------------------------------------------------
def _time_norm_kernel(x_ref, gamma_ref, beta_ref, out_ref, *, n_time):
    x = x_ref[...].astype(jnp.float32)                     # (tb, T, Np)
    mean = jnp.mean(x, axis=1, keepdims=True)              # (tb, 1, Np)
    d = x - mean
    # unbiased variance; T==1 yields inf/nan exactly like torch.var(unbiased)
    var = jnp.sum(d * d, axis=1, keepdims=True) / (n_time - 1)
    inv_std = lax.rsqrt(var + EPS)
    scale = gamma_ref[...] * inv_std
    shift = beta_ref[...] - mean * scale
    out_ref[...] = (x * scale + shift).astype(out_ref.dtype)


def _time_norm(x3d_p, gamma3d_p, beta3d_p, *, tb):
    rows_p, T, Np = x3d_p.shape
    assert rows_p % tb == 0 and Np % 128 == 0
    kernel = functools.partial(_time_norm_kernel, n_time=T)
    return pl.pallas_call(
        kernel,
        out_shape=jax.ShapeDtypeStruct((rows_p, T, Np), x3d_p.dtype),
        grid=(rows_p // tb,),
        in_specs=[pl.BlockSpec((tb, T, Np), lambda i: (i, 0, 0)),
                  pl.BlockSpec((tb, 1, Np), lambda i: (i, 0, 0)),
                  pl.BlockSpec((tb, 1, Np), lambda i: (i, 0, 0))],
        out_specs=pl.BlockSpec((tb, T, Np), lambda i: (i, 0, 0)),
        compiler_params=pltpu.CompilerParams(
            dimension_semantics=("parallel",),
            vmem_limit_bytes=_VMEM_LIMIT_BYTES),
    )(x3d_p, gamma3d_p, beta3d_p)


# ---------------------------------------------------------------------------
# Module wrapper (parameters initialized like the PyTorch __init__:
# beta=0, gamma=1, running_mean=0, running_var=1).
# ---------------------------------------------------------------------------
class TNormPallas:
    def __init__(self, num_nodes, channels, track_running_stats=True, momentum=0.1):
        self.track_running_stats = track_running_stats
        self.momentum = momentum
        self.num_nodes = num_nodes
        self.channels = channels
        self.beta = jnp.zeros((1, channels, num_nodes, 1), jnp.float32)
        self.gamma = jnp.ones((1, channels, num_nodes, 1), jnp.float32)
        self.running_mean = jnp.zeros((1, channels, num_nodes, 1), jnp.float32)
        self.running_var = jnp.ones((1, channels, num_nodes, 1), jnp.float32)

    def __call__(self, x, training=True):
        B, C, N, T = x.shape
        CN = C * N

        if self.track_running_stats:
            # Layout: (C*N, B*T) — reduce over batch & time per (channel, node).
            cols = B * T
            cols_p = _round_up(cols, 128)                   # lane-dense stores
            itemsize = x.dtype.itemsize
            per_row = 2 * cols_p * 2 * itemsize             # 2x-buffered in+out
            tr, _, rows_p = _plan_rows(CN, per_row, align=8)

            x2d = jnp.transpose(x, (1, 2, 0, 3)).reshape(CN, cols)
            x2d_p = _pad2d(x2d, rows_p, cols_p)

            if training:
                g_p = _pad2d(self.gamma.reshape(CN, 1), rows_p, 1)
                b_p = _pad2d(self.beta.reshape(CN, 1), rows_p, 1)
                out2d_p, mean_p, var_p = _stats_norm(
                    x2d_p, g_p, b_p, n_valid=cols, tr=tr)
                mean4 = mean_p[:CN].reshape(1, C, N, 1)
                var4 = var_p[:CN].reshape(1, C, N, 1)
                n = cols
                # NOTE: eager attribute update (mirrors the PyTorch buffer
                # update). Under jax.jit this side effect would not persist —
                # return/thread the stats functionally in that case.
                self.running_mean = (self.momentum * mean4
                                     + (1.0 - self.momentum) * self.running_mean)
                self.running_var = (self.momentum * var4 * n / (n - 1)
                                    + (1.0 - self.momentum) * self.running_var)
            else:
                # Fold running stats + affine into per-row scale/shift (tiny,
                # CN-sized, plain JAX) — kernel does one FMA per element.
                inv = lax.rsqrt(self.running_var.reshape(CN, 1) + EPS)
                scale = self.gamma.reshape(CN, 1) * inv
                shift = (self.beta.reshape(CN, 1)
                         - self.running_mean.reshape(CN, 1) * scale)
                out2d_p = _scale_shift(x2d_p,
                                       _pad2d(scale, rows_p, 1),
                                       _pad2d(shift, rows_p, 1), tr=tr)

            out2d = out2d_p[:CN, :cols]
            out = out2d.reshape(C, N, B, T).transpose(2, 0, 1, 3)
        else:
            # Layout: (B*C, T, N_pad) — nodes on lanes, time reduced on
            # sublanes, unbiased variance.
            rows = B * C
            Np = _round_up(N, 128)
            itemsize = x.dtype.itemsize
            per_row = 2 * T * Np * 2 * itemsize
            tb, _, rows_p = _plan_rows(rows, per_row, align=8)

            x3d = jnp.transpose(x, (0, 1, 3, 2)).reshape(rows, T, N)
            x3d_p = jnp.pad(x3d, ((0, rows_p - rows), (0, 0), (0, Np - N)))

            g = jnp.pad(self.gamma.reshape(C, N), ((0, 0), (0, Np - N)))
            g = jnp.tile(g, (B, 1)).reshape(rows, 1, Np)
            g = jnp.pad(g, ((0, rows_p - rows), (0, 0), (0, 0)))
            b_ = jnp.pad(self.beta.reshape(C, N), ((0, 0), (0, Np - N)))
            b_ = jnp.tile(b_, (B, 1)).reshape(rows, 1, Np)
            b_ = jnp.pad(b_, ((0, rows_p - rows), (0, 0), (0, 0)))

            out3d_p = _time_norm(x3d_p, g, b_, tb=tb)
            out = (out3d_p[:rows, :, :N]
                   .reshape(B, C, T, N)
                   .transpose(0, 1, 3, 2))
        return out


# ---------------------------------------------------------------------------
# Pure-JAX reference mirroring the PyTorch forward (for validation).
# ---------------------------------------------------------------------------
def _ref_forward(x, gamma, beta, running_mean, running_var, track, training):
    if track:
        mean = x.mean(axis=(0, 3), keepdims=True)
        var = jnp.mean((x - mean) ** 2, axis=(0, 3), keepdims=True)  # biased
        if not training:
            mean, var = running_mean, running_var
    else:
        mean = x.mean(axis=3, keepdims=True)
        var = jnp.var(x, axis=3, keepdims=True, ddof=1)              # unbiased
    xn = (x - mean) / jnp.sqrt(var + EPS)
    return xn * gamma + beta


if __name__ == "__main__":
    key = jax.random.PRNGKey(0)
    B, C, N, T = 2, 4, 16, 8
    x = jax.random.normal(key, (B, C, N, T), dtype=jnp.float32)

    ok = True

    # 1) track_running_stats=True, training mode (batch stats)
    mod = TNormPallas(num_nodes=N, channels=C, track_running_stats=True)
    out = jax.block_until_ready(mod(x, training=True))
    ref = _ref_forward(x, mod.gamma, mod.beta,
                       jnp.zeros_like(mod.running_mean),
                       jnp.ones_like(mod.running_var),
                       track=True, training=True)
    ok &= bool(jnp.allclose(out, ref, atol=1e-4, rtol=1e-4))

    # 2) track_running_stats=True, eval mode (running stats, just updated)
    out_eval = jax.block_until_ready(mod(x, training=False))
    ref_eval = _ref_forward(x, mod.gamma, mod.beta,
                            mod.running_mean, mod.running_var,
                            track=True, training=False)
    ok &= bool(jnp.allclose(out_eval, ref_eval, atol=1e-4, rtol=1e-4))

    # 3) track_running_stats=False (per-sample time norm, unbiased var)
    mod2 = TNormPallas(num_nodes=N, channels=C, track_running_stats=False)
    out_nt = jax.block_until_ready(mod2(x))
    ref_nt = _ref_forward(x, mod2.gamma, mod2.beta, None, None,
                          track=False, training=True)
    ok &= bool(jnp.allclose(out_nt, ref_nt, atol=1e-4, rtol=1e-4))

    if not ok:
        raise AssertionError("Pallas TNorm output mismatch vs reference")
    print("KERNEL_OK")
</pallas_src>

<mosaic_0001>
module attributes {stable_mosaic.version = 11 : i64} {
  func.func @_stats_norm_kernel(%arg0: i32, %arg1: memref<32x128xf32, #tpu.memory_space<vmem>>, %arg2: memref<32x1xf32, #tpu.memory_space<vmem>>, %arg3: memref<32x1xf32, #tpu.memory_space<vmem>>, %arg4: memref<32x128xf32, #tpu.memory_space<vmem>>, %arg5: memref<32x1xf32, #tpu.memory_space<vmem>>, %arg6: memref<32x1xf32, #tpu.memory_space<vmem>>) attributes {dimension_semantics = [#tpu.dimension_semantics<parallel>], iteration_bounds = array<i64: 2>, scalar_prefetch = 0 : i64, scratch_operands = 0 : i64, tpu.core_type = #tpu.core_type<tc>, window_params = [{transform_indices = @transform_0, window_bounds = array<i64: 32, 128>}, {transform_indices = @transform_1, window_bounds = array<i64: 32, 1>}, {transform_indices = @transform_2, window_bounds = array<i64: 32, 1>}, {transform_indices = @transform_3, window_bounds = array<i64: 32, 128>}, {transform_indices = @transform_4, window_bounds = array<i64: 32, 1>}, {transform_indices = @transform_5, window_bounds = array<i64: 32, 1>}]} {
    %c0 = arith.constant 0 : index
    %c0_0 = arith.constant 0 : index
    %0 = vector.load %arg1[%c0, %c0_0] : memref<32x128xf32, #tpu.memory_space<vmem>>, vector<32x128xf32>
    %1 = tpu.iota {dimensions = array<i32: 1>} : vector<32x128xi32>
    %c16_i32 = arith.constant 16 : i32
    %2 = vector.broadcast %c16_i32 : i32 to vector<32x128xi32>
    %3 = arith.cmpi slt, %1, %2 : vector<32x128xi32>
    %cst = arith.constant dense<0.000000e+00> : vector<32xf32>
    %4 = vector.multi_reduction <add>, %0, %cst [1] : vector<32x128xf32> to vector<32xf32>
    %5 = vector.shape_cast %4 : vector<32xf32> to vector<32x1xf32>
    %cst_1 = arith.constant 6.250000e-02 : f32
    %6 = vector.broadcast %cst_1 : f32 to vector<32x1xf32>
    %7 = arith.mulf %5, %6 : vector<32x1xf32>
    %8 = vector.broadcast %7 : vector<32x1xf32> to vector<32x128xf32>
    %9 = arith.subf %0, %8 : vector<32x128xf32>
    %cst_2 = arith.constant 0.000000e+00 : f32
    %10 = vector.broadcast %cst_2 : f32 to vector<32x128xf32>
    %11 = arith.select %3, %9, %10 : vector<32x128xi1>, vector<32x128xf32>
    %12 = arith.mulf %11, %11 : vector<32x128xf32>
    %cst_3 = arith.constant dense<0.000000e+00> : vector<32xf32>
    %13 = vector.multi_reduction <add>, %12, %cst_3 [1] : vector<32x128xf32> to vector<32xf32>
    %14 = vector.shape_cast %13 : vector<32xf32> to vector<32x1xf32>
    %cst_4 = arith.constant 6.250000e-02 : f32
    %15 = vector.broadcast %cst_4 : f32 to vector<32x1xf32>
    %16 = arith.mulf %14, %15 : vector<32x1xf32>
    %cst_5 = arith.constant 9.99999974E-6 : f32
    %17 = vector.broadcast %cst_5 : f32 to vector<32x1xf32>
    %18 = arith.addf %16, %17 : vector<32x1xf32>
    %19 = math.rsqrt %18 : vector<32x1xf32>
    %c0_6 = arith.constant 0 : index
    %c0_7 = arith.constant 0 : index
    %20 = vector.load %arg2[%c0_6, %c0_7] : memref<32x1xf32, #tpu.memory_space<vmem>>, vector<32x1xf32>
    %21 = arith.mulf %20, %19 : vector<32x1xf32>
    %c0_8 = arith.constant 0 : index
    %c0_9 = arith.constant 0 : index
    %22 = vector.load %arg3[%c0_8, %c0_9] : memref<32x1xf32, #tpu.memory_space<vmem>>, vector<32x1xf32>
    %23 = arith.mulf %7, %21 : vector<32x1xf32>
    %24 = arith.subf %22, %23 : vector<32x1xf32>
    %25 = vector.broadcast %21 : vector<32x1xf32> to vector<32x128xf32>
    %26 = arith.mulf %0, %25 : vector<32x128xf32>
    %27 = vector.broadcast %24 : vector<32x1xf32> to vector<32x128xf32>
    %28 = arith.addf %26, %27 : vector<32x128xf32>
    %c0_10 = arith.constant 0 : index
    %c0_11 = arith.constant 0 : index
    %29 = vector.load %arg4[%c0_10, %c0_11] : memref<32x128xf32, #tpu.memory_space<vmem>>, vector<32x128xf32>
    tpu.vector_store %arg4[%c0_10, %c0_11], %28 {strides = array<i32>} : memref<32x128xf32, #tpu.memory_space<vmem>>, vector<32x128xf32>,
    %c0_12 = arith.constant 0 : index
    %c0_13 = arith.constant 0 : index
    %30 = vector.load %arg5[%c0_12, %c0_13] : memref<32x1xf32, #tpu.memory_space<vmem>>, vector<32x1xf32>
    tpu.vector_store %arg5[%c0_12, %c0_13], %7 {strides = array<i32>} : memref<32x1xf32, #tpu.memory_space<vmem>>, vector<32x1xf32>,
    %c0_14 = arith.constant 0 : index
    %c0_15 = arith.constant 0 : index
    %31 = vector.load %arg6[%c0_14, %c0_15] : memref<32x1xf32, #tpu.memory_space<vmem>>, vector<32x1xf32>
    tpu.vector_store %arg6[%c0_14, %c0_15], %16 {strides = array<i32>} : memref<32x1xf32, #tpu.memory_space<vmem>>, vector<32x1xf32>,
    return
  }
  func.func @transform_0(%arg0: i32) -> (i32, i32) {
    %c0_i32 = arith.constant 0 : i32
    %c0_i32_0 = arith.constant 0 : i32
    return %arg0, %c0_i32 : i32, i32
  }
  func.func @transform_1(%arg0: i32) -> (i32, i32) {
    %c0_i32 = arith.constant 0 : i32
    %c0_i32_0 = arith.constant 0 : i32
    return %arg0, %c0_i32 : i32, i32
  }
  func.func @transform_2(%arg0: i32) -> (i32, i32) {
    %c0_i32 = arith.constant 0 : i32
    %c0_i32_0 = arith.constant 0 : i32
    return %arg0, %c0_i32 : i32, i32
  }
  func.func @transform_3(%arg0: i32) -> (i32, i32) {
    %c0_i32 = arith.constant 0 : i32
    %c0_i32_0 = arith.constant 0 : i32
    return %arg0, %c0_i32 : i32, i32
  }
  func.func @transform_4(%arg0: i32) -> (i32, i32) {
    %c0_i32 = arith.constant 0 : i32
    %c0_i32_0 = arith.constant 0 : i32
    return %arg0, %c0_i32 : i32, i32
  }
  func.func @transform_5(%arg0: i32) -> (i32, i32) {
    %c0_i32 = arith.constant 0 : i32
    %c0_i32_0 = arith.constant 0 : i32
    return %arg0, %c0_i32 : i32, i32
  }
}

</mosaic_0001>

<bundles_post_ra>
// kernel: tpu_custom_call.1
= control target key start
LH: loop header
LB: loop body
LE: loop exit
PB: predicated region body
PF: predicated region fallthrough
CT: control target
= control target key end

     0   :  { %11 = vsyncpa [#allocation3], 0  ;;  %s941_s0 = inlined_call_operand.vmem [shape: f32[64,128], index: 0, kind: input, shape index: {}]   ;;  %s942_s1 = inlined_call_operand.vmem [shape: f32[64,1], index: 1, kind: input, shape index: {}]   ;;  %s943_s2 = inlined_call_operand.vmem [shape: f32[64,1], index: 2, kind: input, shape index: {}]   ;;  %s944_s3 = inlined_call_operand.hbm [shape: f32[64,128], index: 3, kind: output, shape index: {0}]   ;;  %s945_s4 = inlined_call_operand.vmem [shape: f32[64,1], index: 4, kind: output, shape index: {1}]   ;;  %s946_s5 = inlined_call_operand.vmem [shape: f32[64,1], index: 5, kind: output, shape index: {2}]  }
   0x1   :  { %13 = vsyncpa [#allocation3 + $0x1], 0  ;;  %s768_s18 = smov 0   ;;  %s770_s19 = smov 0  }
   0x2   :  { %s772_s20 = smov 0   ;;  %s774_s21 = smov 0  }
   0x3 LB: > { %s789_s22 = sadd.s32 4294967295, %s732_s21   ;;  %s597_s23 = sadd.s32 4294967294, %s732_s21   ;;  %s732_s21 = sphi %s774_s21, %s952_s21   ;;  %s728_s20 = sphi %s772_s20, %s951_s20   ;;  %s724_s19 = sphi %s770_s19, %s950_s19   ;;  %s720_s18 = sphi %s768_s18, %s949_s18  }
   0x4   : > { %s793_s24 = sadd.s32 1, %s732_s21   ;;  %s104_s25 = sadd.s32 1, %s728_s20 }
   0x5   : > { %s101_s26 = ssub.s32 %s732_s21, %s793_s24  ;;  %p114_p0 = scmp.ne.s32.totalorder %s728_s20, %s724_s19 }
   0x6   : > { %p102_p1 = scmp.eq.s32.totalorder %s101_s26, 0  ;;  %p115_p2 = scmp.eq.s32.totalorder %s789_s22, 1 }
   0x7   : > { %p120_p3 = scmp.ne.s32.totalorder %s724_s19, %s720_s18  ;;  %p121_p4 = scmp.eq.s32.totalorder %s597_s23, 1 }
   0x8   : > { %s804_s27 = scalar_select %p102_p1, %s728_s20, %s104_s25  }
   0x9   : > { %p806_p5 = por %p115_p2, %p114_p0  ;;  %p810_p6 = por %p121_p4, %p120_p3 }
   0xa   : > { %p600_p7 = scmp.ge.s32.totalorder %s732_s21, 1  ;;  %p218_p8 = scmp.lt.s32.totalorder %s732_s21, 3 }
   0xc   : > { %p219_p9 = pnand %p600_p7, %p218_p8 }
   0xd   : > { %s602_s30 = sshll.u32 (!%p219_p9), %s789_s22, 2  ;;  %v301_v4 = vlaneseq (!%p219_p9)  ;;  %vm420_vm0 = vcmask (!%p219_p9), 7168   ;;  %v734_v26 = vmov (!%p219_p9), 0   ;;  %s617_s10 = sshll.u32 (!%p219_p9), %s789_s22, 9 }
   0xe   : > { %222 = sbr.rel (%p219_p9) target bundleno = 506 (0x1fa), region = 32  ;;  %p267_p10 = scmp.lt.s32.totalorder (!%p219_p9), %s602_s30, 7  ;;  %660 = vset.pattern.permute.xlu0 (!%p219_p9), %v734_v26  ;;  %661 = vset.pattern.permute.xlu1 (!%p219_p9), %v734_v26 }
   0xf   : > { %v302_v5 = vand.u32 (!%p219_p9), 127, %v301_v4  ;;  %s898_s13 = scalar_lea.hbm (!%p219_p9), %s944_s3, %s617_s10  ;;  %s735_s22 = smov (!%p219_p9), [#allocation2]  }
  0x10   : > { %s674_s16 = sshll.u32 (!%p219_p9), %s735_s22, 4  ;;  %s675_s16 = int_to_ptr.vmem [resolvable:$false] %s674_s16 }
  0x11   : > { %vm303_vm1 = vcmp.lt.s32.totalorder (!%p219_p9), %v302_v5, 16  ;;  %s676_s17 = scalar_lea.vmem (!%p219_p9), %s675_s16, 1024 }
  0x15   : > { %s954_s30 = smov (!%p267_p10, %s602_s30), 7 }
  0x16   : > { %s817_s6 = sshll.u32 %s954_s30, 3 }
  0x17   : > { %s270_s9 = scalar_lea.vmem %s941_s0, %s817_s6  ;;  %s289_s12 = scalar_lea.vmem %s945_s4, %s817_s6 }
  0x18   : > { %v823_v0 = vld [vmem:[%s270_s9] sm:$0xff]  ;;  %v825_v1 = vld [vmem:[%s270_s9 + $0x10] sm:$0xff]  ;;  %v829_v2 = vld [vmem:[%s270_s9 + $0x8] sm:$0xff]  ;;  %s295_s15 = scalar_lea.vmem %s946_s5, %s817_s6  ;;  %s276_s23 = scalar_lea.vmem %s942_s1, %s817_s6 }
  0x19   : > { %304 = vadd.xlane.f32.xlu0 %v823_v0  ;;  %308 = vadd.xlane.f32.xlu1 %v825_v1  ;;  %v831_v3 = vld [vmem:[%s270_s9 + $0x18] sm:$0xff]  ;;  %v348_v39 = vld [vmem:[%s276_s23] sm:$0xff]  ;;  %v349_v42 = vld [vmem:[%s276_s23 + $0x8] sm:$0xff]  ;;  %s282_s30 = scalar_lea.vmem %s943_s2, %s817_s6  ;;  %s249_s6 = sand.u32 1, %s724_s19  }
  0x1a   : > { %v350_v46 = vld [vmem:[%s276_s23 + $0x10] sm:$0xff]  ;;  %v351_v49 = vld [vmem:[%s276_s23 + $0x18] sm:$0xff]  ;;  %v356_v52 = vld [vmem:[%s282_s30] sm:$0xff]  ;;  %s601_s7 = sshll.u32 %s249_s6, 5  ;;  %s900_s14 = scalar_lea.sflag [#allocation3], %s249_s6 }
  0x1b   : > { %v357_v55 = vld [vmem:[%s282_s30 + $0x8] sm:$0xff]  ;;  %v358_v58 = vld [vmem:[%s282_s30 + $0x10] sm:$0xff]  ;;  %v359_v61 = vld [vmem:[%s282_s30 + $0x18] sm:$0xff]  ;;  %s251_s8 = scalar_lea.vmem [#allocation2], %s601_s7 }
  0x1c   : > { %s453_s9 = sshll.u32 %s251_s8, 4  ;;  %s893_s9 = int_to_ptr.vmem [resolvable:$true] %s453_s9 }
  0x1d   : > { %306 = vadd.xlane.f32.xlu0 %v829_v2  ;;  %310 = vadd.xlane.f32.xlu1 %v831_v3  ;;  %p677_p0 = scmp.lt.s32.totalorder %s893_s9, %s675_s16 }
  0xa6   : > { %v305_v6 = vpop.xlane.xlu0 %304  ;;  %v309_v7 = vpop.xlane.xlu1 %308 }
  0xa7   : > { %v839_v8 = vmul.f32 0.0625, %v305_v6  ;;  %v841_v9 = vmul.f32 0.0625, %v309_v7 }
  0xa9   : > { %421 = vst.msk [vmem:[%s289_s12] sm:$0xff] %vm420_vm0, %v839_v8  ;;  %v316_v10 = vsub.f32 %v823_v0, %v839_v8  ;;  %v318_v11 = vsub.f32 %v825_v1, %v841_v9  ;;  %423 = vst.msk [vmem:[%s289_s12 + $0x10] sm:$0xff] %vm420_vm0, %v841_v9 }
  0xaa   : > { %v307_v12 = vpop.xlane.xlu0 %306  ;;  %v311_v13 = vpop.xlane.xlu1 %310 }
  0xab   : > { %v849_v14 = vmul.f32 0.0625, %v307_v12  ;;  %v851_v15 = vmul.f32 0.0625, %v311_v13  ;;  %v320_v16 = vsel %vm303_vm1, %v316_v10, 0.0  ;;  %v322_v17 = vsel %vm303_vm1, %v318_v11, 0.0 }
  0xac   : > { %v324_v18 = vmul.f32 %v320_v16, %v320_v16  ;;  %v326_v21 = vmul.f32 %v322_v17, %v322_v17 }
  0xad   : > { %422 = vst.msk [vmem:[%s289_s12 + $0x8] sm:$0xff] %vm420_vm0, %v849_v14  ;;  %v317_v19 = vsub.f32 %v829_v2, %v849_v14  ;;  %v319_v20 = vsub.f32 %v831_v3, %v851_v15  ;;  %424 = vst.msk [vmem:[%s289_s12 + $0x18] sm:$0xff] %vm420_vm0, %v851_v15 }
  0xae   : > { %328 = vadd.xlane.f32.xlu0 %v324_v18 }
  0xaf   : > { %v321_v22 = vsel %vm303_vm1, %v317_v19, 0.0  ;;  %v323_v23 = vsel %vm303_vm1, %v319_v20, 0.0 }
  0xb0   : > { %v325_v24 = vmul.f32 %v321_v22, %v321_v22  ;;  %v327_v25 = vmul.f32 %v323_v23, %v323_v23 }
  0xb2   : > { %332 = vadd.xlane.f32.xlu0 %v326_v21  ;;  %330 = vadd.xlane.f32.xlu1 %v325_v24 }
  0xb6   : > { %334 = vadd.xlane.f32.xlu1 %v327_v25 }
 0x13b   : > { %v329_v27 = vpop.xlane.xlu0 %328 }
 0x13c   : > { %v336_v28 = vmul.f32 0.0625, %v329_v27 }
 0x13e   : > { %v340_v29 = vadd.f32 1e-05, %v336_v28  ;;  %425 = vst.msk [vmem:[%s295_s15] sm:$0xff] %vm420_vm0, %v336_v28 }
 0x13f   : > { %v331_v30 = vpop.xlane.xlu1 %330  ;;  %v333_v31 = vpop.xlane.xlu0 %332 }
 0x140   : > { %662 = vrsqrt.f32 %v340_v29  ;;  %v337_v32 = vmul.f32 0.0625, %v331_v30  ;;  %v338_v33 = vmul.f32 0.0625, %v333_v31 }
 0x142   : > { %v341_v34 = vadd.f32 1e-05, %v337_v32  ;;  %426 = vst.msk [vmem:[%s295_s15 + $0x8] sm:$0xff] %vm420_vm0, %v337_v32  ;;  %v342_v35 = vadd.f32 1e-05, %v338_v33  ;;  %427 = vst.msk [vmem:[%s295_s15 + $0x10] sm:$0xff] %vm420_vm0, %v338_v33 }
 0x143   : > { %v335_v36 = vpop.xlane.xlu1 %334 }
 0x144   : > { %664 = vrsqrt.f32 %v341_v34  ;;  %v339_v37 = vmul.f32 0.0625, %v335_v36 }
 0x145   : > { %666 = vrsqrt.f32 %v342_v35 }
 0x146   : > { %v343_v38 = vadd.f32 1e-05, %v339_v37  ;;  %428 = vst.msk [vmem:[%s295_s15 + $0x18] sm:$0xff] %vm420_vm0, %v339_v37  ;;  %s670_s15 = scalar_lea.vmem %s893_s9, 512 }
 0x147   : > { %p671_p11 = scmp.ne.s32.totalorder %s893_s9, %s670_s15  ;;  %p678_p1 = scmp.lt.s32.totalorder %s676_s17, %s670_s15 }
 0x148   : > { %668 = vrsqrt.f32 %v343_v38 }
 0x149   : > { %p672_p12 = pnand %p671_p11, %p806_p5  ;;  %p679_p2 = por %p678_p1, %p677_p0 }
 0x14a   : > { %v663_v40 = vpop.eup %662 }
 0x14b   : > { %v352_v41 = vmul.f32 %v663_v40, %v348_v39  ;;  %p673_p13 = pneg %p672_p12 }
 0x14d   : > { %370 = vperm.xlu0 %660, %v352_v41   ;;  %v360_v51 = vmul.f32 %v352_v41, %v839_v8  ;;  %p680_p3 = pnand %p679_p2, %p673_p13 }
 0x14e   : > { %v665_v43 = vpop.eup %664 }
 0x14f   : > { %v353_v44 = vmul.f32 %v665_v43, %v349_v42  ;;  %v667_v45 = vpop.eup %666  ;;  %v364_v53 = vsub.f32 %v356_v52, %v360_v51 }
 0x150   : > { %v354_v47 = vmul.f32 %v667_v45, %v350_v46 }
 0x151   : > { %375 = vperm.xlu1 %661, %v353_v44   ;;  %v361_v54 = vmul.f32 %v353_v44, %v849_v14 }
 0x152   : > { %v669_v48 = vpop.eup %668  ;;  %v362_v57 = vmul.f32 %v354_v47, %v841_v9 }
 0x153   : > { %v355_v50 = vmul.f32 %v669_v48, %v351_v49  ;;  %v365_v56 = vsub.f32 %v357_v55, %v361_v54 }
 0x154   : > { %v366_v59 = vsub.f32 %v358_v58, %v362_v57 }
 0x155   : > { %380 = vperm.xlu1 %661, %v354_v47   ;;  %v363_v60 = vmul.f32 %v355_v50, %v851_v15 }
 0x157   : > { %v367_v62 = vsub.f32 %v359_v61, %v363_v60 }
 0x159   : > { %385 = vperm.xlu1 %661, %v355_v50  }
 0x15d   : > { %394 = vperm.xlu1 %661, %v364_v53  }
 0x161   : > { %399 = vperm.xlu1 %661, %v365_v56  }
 0x165   : > { %404 = vperm.xlu1 %661, %v366_v59  }
 0x169   : > { %409 = vperm.xlu1 %661, %v367_v62  }
 0x1cc   : > { %v371_v5 = vpop.permute.xlu0 %370 }
 0x1cd   : > { %v388_v7 = vmul.f32 %v371_v5, %v823_v0 }
 0x1d0   : > { %v376_v63 = vpop.permute.xlu1 %375 }
 0x1d1   : > { %v389_v10 = vmul.f32 %v376_v63, %v829_v2 }
 0x1d4   : > { %v381_v4 = vpop.permute.xlu1 %380 }
 0x1d5   : > { %v390_v13 = vmul.f32 %v381_v4, %v825_v1 }
 0x1d8   : > { %v386_v6 = vpop.permute.xlu1 %385 }
 0x1d9   : > { %v391_v16 = vmul.f32 %v386_v6, %v831_v3 }
 0x1dc   : > { %v395_v8 = vpop.permute.xlu1 %394 }
 0x1dd   : > { %v412_v9 = vadd.f32 %v395_v8, %v388_v7 }
 0x1df   : > { %416 = vst [vmem:[%s251_s8] sm:$0xff] %v412_v9 }
 0x1e0   : > { %v400_v11 = vpop.permute.xlu1 %399 }
 0x1e1   : > { %v413_v12 = vadd.f32 %v400_v11, %v389_v10 }
 0x1e3   : > { %417 = vst [vmem:[%s251_s8 + $0x8] sm:$0xff] %v413_v12 }
 0x1e4   : > { %v405_v14 = vpop.permute.xlu1 %404 }
 0x1e5   : > { %v414_v15 = vadd.f32 %v405_v14, %v390_v13 }
 0x1e7   : > { %418 = vst [vmem:[%s251_s8 + $0x10] sm:$0xff] %v414_v15 }
 0x1e8   : > { %v410_v0 = vpop.permute.xlu1 %409 }
 0x1e9   : > { %v415_v2 = vadd.f32 %v410_v0, %v391_v16 }
 0x1eb   : > { %419 = vst [vmem:[%s251_s8 + $0x18] sm:$0xff] %v415_v2 }
 0x1ec   : > { %683 = shalt.err (!%p680_p3)
}
 0x1ed   : > { %s684_s23 = scalar_lea.hbm %s898_s13, 512  ;;  %s688_s30 = scalar_lea.hbm %s944_s3, 1024 }
 0x1ee   : > { %p685_p4 = scmp.ne.s32.totalorder %s898_s13, %s684_s23  ;;  %p689_p9 = scmp.lt.u32.totalorder %s898_s13, %s944_s3 }
 0x1ef   : > { %p690_p10 = scmp.lt.u32.totalorder %s688_s30, %s684_s23  ;;  %p692_p12 = scmp.lt.u32.totalorder %s684_s23, %s898_s13 }
 0x1f0   : > { %p686_p7 = pnand %p685_p4, %p806_p5 }
 0x1f1   : > { %p691_p11 = por %p690_p10, %p689_p9 }
 0x1f2   : > { %p687_p8 = pneg %p686_p7 }
 0x1f3   : > { %p693_p13 = por %p692_p12, %p691_p11 }
 0x1f5   : > { %p694_p0 = pnand %p693_p13, %p687_p8 }
 0x1f7   : > { %697 = shalt.err (!%p694_p0)
}
 0x1f8   : > { %s736_s8 = smov 128   ;;  %s737_s10 = smov 8  }
 0x1f9   : > { %618 = dma.vmem_to_hbm [thread:$0]  (%p806_p5), %s893_s9, 512, %s898_s13, %s900_s14, %s736_s8, %s736_s8, %s737_s10  }
 0x1fa PF: > { %p624_p1 = scmp.ge.s32.totalorder %s732_s21, 2  ;;  %s476_s11 = sand.u32 1, %s720_s18  }
 0x1fb   : > { %s477_s12 = scalar_lea.sflag [#allocation3], %s476_s11 }
 0x1fc   : > { %p621_p2 = pnand %p624_p1, %p810_p6 }
 0x1fe   : > { %715 = dma.done.wait (!%p621_p2), %s477_s12, 512  }
 0x1ff   : > { %717 = vsyncadd (!%p621_p2), %s477_s12, 4294966784  ;;  %p16_p3 = scmp.ge.s32.totalorder %s793_s24, 4   ;;  %s949_s18 = smov %s724_s19 }
 0x200   : > { %s950_s19 = smov %s728_s20  ;;  %s951_s20 = smov %s804_s27 }
 0x201   : > { %s952_s21 = smov %s793_s24  ;;  %18 = sbr.rel (!%p16_p3) target bundleno = 3 (0x3), region = 97 }
 0x208   :  { %498 = vsyncpa [#allocation3], 1 }
 0x209   :  { %500 = vsyncpa [#allocation3 + $0x1], 1 }

</bundles_post_ra>
